<compile_context>
chip_gen: v5e
topology: v5e:2x2
jax: 0.10.0
libtpu: 0.0.40
codegen_flags: <defaults>
</compile_context>

<pallas_src>
import functools

import jax
import jax.numpy as jnp
from jax.experimental import pallas as pl
from jax.experimental.pallas import tpu as pltpu


def _round_up(x, m):
    return ((x + m - 1) // m) * m


def _cdiv(a, b):
    return (a + b - 1) // b


# In-kernel hardware PRNG only exists on the TPU backend; elsewhere (e.g. the
# CPU/interpret sandbox) we stream the reparameterization noise as an input.
_USE_TPU_PRNG = jax.default_backend() == "tpu"


# ----------------------------------------------------------------------------
# Pallas kernels
# ----------------------------------------------------------------------------
def _fused_train_math(px, wm, wv, b_mu, b_sig2, zeta, out_ref):
    """psi   = Wm(O,K)  @ px(K,tm)   + b_mu
       delta = Wv(O,K)  @ px^2(K,tm) + b_sigma^2
       out   = psi + sqrt(delta) * zeta."""
    psi = jnp.dot(wm, px, preferred_element_type=jnp.float32) + b_mu
    pxf = px.astype(jnp.float32)                       # square in-kernel, f32
    delta = jnp.dot(wv, pxf * pxf, preferred_element_type=jnp.float32) + b_sig2
    # tiny-epsilon clamp: guards bf16/f32 rounding and keeps a future sqrt-VJP finite
    out_ref[...] = (psi + jnp.sqrt(jnp.maximum(delta, 1e-12)) * zeta
                    ).astype(out_ref.dtype)


def _fused_train_kernel_tpu(seed_ref, px_ref, wm_ref, wv_ref, bmu_ref,
                            bs2_ref, out_ref):
    """TPU-only: zeta drawn from the hardware PRNG (no zeta HBM stream)."""
    # Multi-argument seeding: unique, non-overflowing stream per (batch, tile),
    # decorrelated across pallas_call invocations and megacore shards.
    pltpu.prng_seed(seed_ref[0], pl.program_id(0), pl.program_id(1))
    zeta = pltpu.stateful_normal(out_ref.shape, jnp.float32)
    _fused_train_math(px_ref[...], wm_ref[...], wv_ref[...],
                      bmu_ref[...], bs2_ref[...], zeta, out_ref)


def _fused_train_kernel_streamed(px_ref, wm_ref, wv_ref, bmu_ref, bs2_ref,
                                 zeta_ref, out_ref):
    """Portable fallback: zeta streamed from HBM (works in interpret mode)."""
    _fused_train_math(px_ref[...], wm_ref[...], wv_ref[...],
                      bmu_ref[...], bs2_ref[...],
                      zeta_ref[...].astype(jnp.float32), out_ref)


def _eval_conv_kernel(px_ref, w_ref, b_ref, out_ref):
    """Lean eval path: single matmul + bias."""
    out_ref[...] = (jnp.dot(w_ref[...], px_ref[...],
                            preferred_element_type=jnp.float32)
                    + b_ref[...]).astype(out_ref.dtype)


# ----------------------------------------------------------------------------
# Tiling helper
# ----------------------------------------------------------------------------
def _pick_tile_m(M, n_batch):
    """Lane-dense M tile: large (<=4096) to amortize per-step overhead on v7x,
    but guaranteeing >=2 total grid steps (megacore) whenever M allows it.
    Footprint stays <~2 MiB double-buffered -> no vmem_limit_bytes needed."""
    if M <= 128:
        return M                              # full extent (lane-tiling rule)
    tm = min(4096, _round_up(M, 128))
    if n_batch * _cdiv(M, tm) < 2:            # ensure both v7x TCs get work
        tm = _round_up(_cdiv(M, 2), 128)
    return tm


# ----------------------------------------------------------------------------
# Pallas wrappers
# ----------------------------------------------------------------------------
def fused_bayes_conv(px, wm, wv, b_mu, b_sig2, *, seed=None, zeta=None,
                     out_dtype=jnp.float32):
    """Train/ensemble path.
    px: (N, K, M) bf16 patches; wm: (O, K) bf16; wv: (O, K) f32;
    b_mu, b_sig2: (O, 1) f32.
    Exactly one of:
      seed: (1,) int32      -> in-kernel hardware PRNG (TPU backend)
      zeta: (N, O, M) f32   -> streamed noise (portable fallback)
    Returns (N, O, M) out_dtype."""
    N, K, M = px.shape
    O = wm.shape[0]
    tm = _pick_tile_m(M, N)
    grid = (N, _cdiv(M, tm))                  # no explicit padding of M

    px_spec = pl.BlockSpec((None, K, tm), lambda n, j, *_: (n, 0, j))
    w_spec = pl.BlockSpec((O, K), lambda n, j, *_: (0, 0))
    b_spec = pl.BlockSpec((O, 1), lambda n, j, *_: (0, 0))
    o_spec = pl.BlockSpec((None, O, tm), lambda n, j, *_: (n, 0, j))

    flops = 2 * 2 * N * M * K * O             # two matmuls
    bytes_accessed = (px.size * px.dtype.itemsize
                      + N * M * O * jnp.dtype(out_dtype).itemsize
                      + wm.size * 2 + wv.size * 4 + 2 * O * 4)
    cost = pl.CostEstimate(flops=flops, transcendentals=2 * N * M * O,
                           bytes_accessed=bytes_accessed)
    cparams = pltpu.CompilerParams(
        dimension_semantics=("parallel", "parallel"))   # v7x: 2 TCs

    out_shape = jax.ShapeDtypeStruct((N, O, M), out_dtype)

    if seed is not None:
        return pl.pallas_call(
            _fused_train_kernel_tpu,
            out_shape=out_shape,
            grid_spec=pltpu.PrefetchScalarGridSpec(
                num_scalar_prefetch=1,        # PRNG seed -> SMEM
                grid=grid,
                in_specs=[px_spec, w_spec, w_spec, b_spec, b_spec],
                out_specs=o_spec),
            compiler_params=cparams,
            cost_estimate=cost,
        )(seed, px, wm, wv, b_mu, b_sig2)

    zeta_spec = pl.BlockSpec((None, O, tm), lambda n, j, *_: (n, 0, j))
    return pl.pallas_call(
        _fused_train_kernel_streamed,
        out_shape=out_shape,
        grid=grid,
        in_specs=[px_spec, w_spec, w_spec, b_spec, b_spec, zeta_spec],
        out_specs=o_spec,
        compiler_params=cparams,
        cost_estimate=cost,
    )(px, wm, wv, b_mu, b_sig2, zeta)


def conv_matmul(px, w, b, *, out_dtype=jnp.float32):
    """Eval path. px: (N, K, M) bf16; w: (O, K) bf16; b: (O, 1) f32
    -> (N, O, M) out_dtype."""
    N, K, M = px.shape
    O = w.shape[0]
    tm = _pick_tile_m(M, N)
    grid = (N, _cdiv(M, tm))

    return pl.pallas_call(
        _eval_conv_kernel,
        out_shape=jax.ShapeDtypeStruct((N, O, M), out_dtype),
        grid=grid,
        in_specs=[
            pl.BlockSpec((None, K, tm), lambda n, j: (n, 0, j)),
            pl.BlockSpec((O, K), lambda n, j: (0, 0)),
            pl.BlockSpec((O, 1), lambda n, j: (0, 0)),
        ],
        out_specs=pl.BlockSpec((None, O, tm), lambda n, j: (n, 0, j)),
        compiler_params=pltpu.CompilerParams(
            dimension_semantics=("parallel", "parallel")),
        cost_estimate=pl.CostEstimate(
            flops=2 * N * M * K * O, transcendentals=0,
            bytes_accessed=px.size * px.dtype.itemsize
            + N * M * O * jnp.dtype(out_dtype).itemsize + K * O * 2 + O * 4),
    )(px, w, b)


# ----------------------------------------------------------------------------
# Glue: transpose-free im2col, K order = (C, KH, KW) to match PyTorch flatten
# ----------------------------------------------------------------------------
def im2col_nkm(x, kh, kw, stride, padding):
    """x: (N, C, H, W) -> patches (N, C*kh*kw, OH*OW), OH, OW.
    Batch stays the leading axis (no O<->N transpose later); cast x to bf16
    BEFORE calling so the expanded patch matrix is only materialized in bf16."""
    N, C, H, W = x.shape
    xp = jnp.pad(x, ((0, 0), (0, 0), (padding, padding), (padding, padding)))
    OH = (H + 2 * padding - kh) // stride + 1
    OW = (W + 2 * padding - kw) // stride + 1
    cols = []
    for i in range(kh):
        for j in range(kw):
            cols.append(xp[:, :, i:i + stride * OH:stride,
                              j:j + stride * OW:stride])      # (N, C, OH, OW)
    cols = jnp.stack(cols, axis=2)                             # (N, C, kh*kw, OH, OW)
    return cols.reshape(N, C * kh * kw, OH * OW), OH, OW


# ----------------------------------------------------------------------------
# Simplified IAF flow (affine autoregressive, strictly lower-triangular)
# ----------------------------------------------------------------------------
def make_iaf_params(key, dim, num_transforms):
    params = []
    for _ in range(num_transforms):
        key, k1, k2, k3, k4 = jax.random.split(key, 5)
        Lm = 0.1 * jax.random.normal(k1, (dim, dim), jnp.float32)
        bm = 0.1 * jax.random.normal(k2, (dim,), jnp.float32)
        Ls = 0.1 * jax.random.normal(k3, (dim, dim), jnp.float32)
        bs = 0.1 * jax.random.normal(k4, (dim,), jnp.float32)
        params.append((Lm, bm, Ls, bs))
    return params


def iaf_flow(z, params):
    dim = z.shape[0]
    mask = jnp.tril(jnp.ones((dim, dim), jnp.float32), k=-1)
    for (Lm, bm, Ls, bs) in params:
        m = (Lm * mask) @ z + bm
        s = (Ls * mask) @ z + bs
        sig = jax.nn.sigmoid(s)
        z = sig * z + (1.0 - sig) * m
    return z


# ----------------------------------------------------------------------------
# BayesianConv2d parameters + forward
# ----------------------------------------------------------------------------
def init_bayesian_conv2d(key, in_channels, out_channels, kernel_size,
                         num_transforms, lower_init_lambda=-10.0,
                         upper_init_lambda=15.0):
    kh = kw = kernel_size
    ks = jax.random.split(key, 12)
    p = {}
    wshape = (out_channels, in_channels, kh, kw)
    p["weight_mu"] = jax.random.uniform(ks[0], wshape, jnp.float32, -1.2, 1.2)
    p["weight_rho"] = -9.0 + 0.1 * jax.random.normal(ks[1], wshape, jnp.float32)
    p["lambdal"] = jax.random.uniform(ks[2], wshape, jnp.float32,
                                      lower_init_lambda, upper_init_lambda)
    p["bias_mu"] = jax.random.uniform(ks[3], (out_channels,), jnp.float32,
                                      -0.2, 0.2)
    p["bias_rho"] = -9.0 + 1.0 * jax.random.normal(ks[4], (out_channels,),
                                                   jnp.float32)
    p["q0_mean"] = jax.random.normal(ks[5], (out_channels,), jnp.float32)
    p["q0_log_var"] = -9.0 + jax.random.normal(ks[6], (out_channels,),
                                               jnp.float32)
    # r0_c / r0_b1 / r0_b2 are only used in kl_div(), not in forward.
    p["r0_c"] = jax.random.normal(ks[7], (out_channels,), jnp.float32)
    p["r0_b1"] = jax.random.normal(ks[8], (out_channels,), jnp.float32)
    p["r0_b2"] = jax.random.normal(ks[9], (out_channels,), jnp.float32)
    p["z_flow"] = make_iaf_params(ks[10], out_channels, num_transforms)
    p["r_flow"] = make_iaf_params(ks[11], out_channels, num_transforms)
    return p


def sample_z(params, key):
    q0_std = jnp.sqrt(jnp.exp(params["q0_log_var"]))
    eps = jax.random.normal(key, q0_std.shape, jnp.float32)
    z0 = params["q0_mean"] + q0_std * eps
    return iaf_flow(z0, params["z_flow"])


def bayesian_conv2d_forward(params, x, key, *, stride=1, padding=0,
                            training=True, ensemble=False, post_train=False,
                            out_dtype=jnp.float32):
    """x: (N, C, H, W) float32 (NCHW, PyTorch convention).
    out_dtype=jnp.bfloat16 halves the output HBM stream if the next layer
    tolerates bf16 activations (default f32 preserves reference semantics)."""
    O, C, kh, kw = params["weight_mu"].shape
    N = x.shape[0]
    Kdim = C * kh * kw

    alpha_q = jax.nn.sigmoid(params["lambdal"])
    if post_train:
        alpha_q = (alpha_q > 0.5).astype(jnp.float32)
    weight_sigma = jnp.log1p(jnp.exp(params["weight_rho"]))
    bias_sigma = jnp.log1p(jnp.exp(params["bias_rho"]))

    key_z, key_zeta, key_w, key_b = jax.random.split(key, 4)
    z = sample_z(params, key_z)
    zc = z[:, None, None, None]

    # bf16 BEFORE patch materialization: the kh*kw-expanded matrix never
    # exists in f32 in HBM.
    px, OH, OW = im2col_nkm(x.astype(jnp.bfloat16), kh, kw, stride, padding)
    M = OH * OW

    if training or ensemble:
        w_mean = params["weight_mu"] * zc * alpha_q
        w_var = alpha_q * (weight_sigma ** 2 +
                           (1.0 - alpha_q) * params["weight_mu"] ** 2 * zc ** 2)
        wm = w_mean.reshape(O, Kdim).astype(jnp.bfloat16)     # (O, K) bf16
        wv = w_var.reshape(O, Kdim)                           # (O, K) f32 (tiny;
        #                                       sigma^2 ~ 1e-8 needs mantissa)
        b_mu = params["bias_mu"].reshape(O, 1)
        b_sig2 = (bias_sigma ** 2).reshape(O, 1)
        if _USE_TPU_PRNG:
            seed = jax.random.randint(key_zeta, (1,), 0, 2 ** 31 - 1,
                                      dtype=jnp.int32)
            out_flat = fused_bayes_conv(px, wm, wv, b_mu, b_sig2,
                                        seed=seed, out_dtype=out_dtype)
        else:
            zeta = jax.random.normal(key_zeta, (N, O, M), jnp.float32)
            out_flat = fused_bayes_conv(px, wm, wv, b_mu, b_sig2,
                                        zeta=zeta, out_dtype=out_dtype)
    else:
        # eval branch: sampled, gated weights; single lean conv kernel
        eps_w = jax.random.normal(key_w, params["weight_mu"].shape, jnp.float32)
        w = params["weight_mu"] * zc + weight_sigma * eps_w
        bias = params["bias_mu"] + bias_sigma * jax.random.normal(
            key_b, params["bias_mu"].shape, jnp.float32)
        g = (alpha_q > 0.5).astype(jnp.float32)
        weight = (w * g).reshape(O, Kdim).astype(jnp.bfloat16)
        out_flat = conv_matmul(px, weight, bias.reshape(O, 1),
                               out_dtype=out_dtype)

    # (N, O, OH*OW) -> (N, O, OH, OW): pure reshape, no transpose.
    return out_flat.reshape(N, O, OH, OW)


# ----------------------------------------------------------------------------
if __name__ == "__main__":
    key = jax.random.PRNGKey(0)
    k_param, k_input, k_fwd = jax.random.split(key, 3)

    in_channels, out_channels = 4, 8
    kernel_size, num_transforms = 3, 2
    padding, stride = 1, 1

    params = init_bayesian_conv2d(k_param, in_channels, out_channels,
                                  kernel_size, num_transforms)

    x = jax.random.normal(k_input, (2, in_channels, 16, 16), jnp.float32)

    train_fwd = jax.jit(functools.partial(
        bayesian_conv2d_forward, stride=stride, padding=padding,
        training=True, ensemble=False))
    out = jax.block_until_ready(train_fwd(params, x, k_fwd))
    assert out.shape == (2, out_channels, 16, 16), out.shape
    assert bool(jnp.all(jnp.isfinite(out))), "non-finite output"

    # eval (sampled-weight) branch through its own lean kernel
    eval_fwd = jax.jit(functools.partial(
        bayesian_conv2d_forward, stride=stride, padding=padding,
        training=False, ensemble=False))
    out_eval = jax.block_until_ready(eval_fwd(params, x, k_fwd))
    assert out_eval.shape == (2, out_channels, 16, 16)
    assert bool(jnp.all(jnp.isfinite(out_eval))), "non-finite eval output"

    print("KERNEL_OK")
</pallas_src>

<mosaic_0001>
module attributes {stable_mosaic.version = 11 : i64} {
  func.func @_fused_train_kernel_streamed(%arg0: i32, %arg1: i32, %arg2: memref<1x36x256xbf16, #tpu.memory_space<vmem>>, %arg3: memref<8x36xbf16, #tpu.memory_space<vmem>>, %arg4: memref<8x36xf32, #tpu.memory_space<vmem>>, %arg5: memref<8x1xf32, #tpu.memory_space<vmem>>, %arg6: memref<8x1xf32, #tpu.memory_space<vmem>>, %arg7: memref<1x8x256xf32, #tpu.memory_space<vmem>>, %arg8: memref<1x8x256xf32, #tpu.memory_space<vmem>>) attributes {dimension_semantics = [#tpu.dimension_semantics<parallel>, #tpu.dimension_semantics<parallel>], iteration_bounds = array<i64: 2, 1>, scalar_prefetch = 0 : i64, scratch_operands = 0 : i64, tpu.core_type = #tpu.core_type<tc>, window_params = [{transform_indices = @transform_0, window_bounds = array<i64: 1, 36, 256>}, {pipeline_mode = #tpu.pipeline_mode<synchronous>, transform_indices = @transform_1, window_bounds = array<i64: 8, 36>}, {pipeline_mode = #tpu.pipeline_mode<synchronous>, transform_indices = @transform_2, window_bounds = array<i64: 8, 36>}, {pipeline_mode = #tpu.pipeline_mode<synchronous>, transform_indices = @transform_3, window_bounds = array<i64: 8, 1>}, {pipeline_mode = #tpu.pipeline_mode<synchronous>, transform_indices = @transform_4, window_bounds = array<i64: 8, 1>}, {transform_indices = @transform_5, window_bounds = array<i64: 1, 8, 256>}, {transform_indices = @transform_6, window_bounds = array<i64: 1, 8, 256>}]} {
    %c0 = arith.constant 0 : index
    %c0_0 = arith.constant 0 : index
    %c0_1 = arith.constant 0 : index
    %0 = vector.load %arg2[%c0, %c0_0, %c0_1] : memref<1x36x256xbf16, #tpu.memory_space<vmem>>, vector<1x36x256xbf16>
    %1 = vector.shape_cast %0 : vector<1x36x256xbf16> to vector<36x256xbf16>
    %c0_2 = arith.constant 0 : index
    %c0_3 = arith.constant 0 : index
    %2 = vector.load %arg3[%c0_2, %c0_3] : memref<8x36xbf16, #tpu.memory_space<vmem>>, vector<8x36xbf16>
    %c0_4 = arith.constant 0 : index
    %c0_5 = arith.constant 0 : index
    %3 = vector.load %arg4[%c0_4, %c0_5] : memref<8x36xf32, #tpu.memory_space<vmem>>, vector<8x36xf32>
    %c0_6 = arith.constant 0 : index
    %c0_7 = arith.constant 0 : index
    %4 = vector.load %arg5[%c0_6, %c0_7] : memref<8x1xf32, #tpu.memory_space<vmem>>, vector<8x1xf32>
    %c0_8 = arith.constant 0 : index
    %c0_9 = arith.constant 0 : index
    %5 = vector.load %arg6[%c0_8, %c0_9] : memref<8x1xf32, #tpu.memory_space<vmem>>, vector<8x1xf32>
    %c0_10 = arith.constant 0 : index
    %c0_11 = arith.constant 0 : index
    %c0_12 = arith.constant 0 : index
    %6 = vector.load %arg7[%c0_10, %c0_11, %c0_12] : memref<1x8x256xf32, #tpu.memory_space<vmem>>, vector<1x8x256xf32>
    %7 = vector.shape_cast %6 : vector<1x8x256xf32> to vector<8x256xf32>
    %cst = arith.constant dense<0.000000e+00> : vector<8x256xf32>
    %8 = tpu.matmul %2, %1, %cst {dimension_numbers = #tpu.dot_dimension_numbers<[1], [0], [0], [1], [0, 0, 1, 1], [], []>} : vector<8x36xbf16>, vector<36x256xbf16>, vector<8x256xf32> -> vector<8x256xf32>
    %9 = vector.broadcast %4 : vector<8x1xf32> to vector<8x256xf32>
    %10 = arith.addf %8, %9 : vector<8x256xf32>
    %11 = arith.extf %1 : vector<36x256xbf16> to vector<36x256xf32>
    %12 = arith.mulf %11, %11 : vector<36x256xf32>
    %cst_13 = arith.constant dense<0.000000e+00> : vector<8x256xf32>
    %13 = tpu.matmul %3, %12, %cst_13 {dimension_numbers = #tpu.dot_dimension_numbers<[1], [0], [0], [1], [0, 0, 1, 1], [], []>} : vector<8x36xf32>, vector<36x256xf32>, vector<8x256xf32> -> vector<8x256xf32>
    %14 = vector.broadcast %5 : vector<8x1xf32> to vector<8x256xf32>
    %15 = arith.addf %13, %14 : vector<8x256xf32>
    %cst_14 = arith.constant 9.99999996E-13 : f32
    %16 = vector.broadcast %cst_14 : f32 to vector<8x256xf32>
    %17 = arith.maximumf %15, %16 : vector<8x256xf32>
    %18 = math.sqrt %17 : vector<8x256xf32>
    %19 = arith.mulf %18, %7 : vector<8x256xf32>
    %20 = arith.addf %10, %19 : vector<8x256xf32>
    %c0_15 = arith.constant 0 : index
    %c0_16 = arith.constant 0 : index
    %c0_17 = arith.constant 0 : index
    %21 = vector.load %arg8[%c0_15, %c0_16, %c0_17] : memref<1x8x256xf32, #tpu.memory_space<vmem>>, vector<1x8x256xf32>
    %22 = vector.shape_cast %21 : vector<1x8x256xf32> to vector<8x256xf32>
    %23 = vector.shape_cast %20 : vector<8x256xf32> to vector<1x8x256xf32>
    tpu.vector_store %arg8[%c0_15, %c0_16, %c0_17], %23 {strides = array<i32>} : memref<1x8x256xf32, #tpu.memory_space<vmem>>, vector<1x8x256xf32>,
    return
  }
  func.func @transform_0(%arg0: i32, %arg1: i32) -> (i32, i32, i32) {
    %c0_i32 = arith.constant 0 : i32
    %c0_i32_0 = arith.constant 0 : i32
    return %arg0, %c0_i32, %arg1 : i32, i32, i32
  }
  func.func @transform_1(%arg0: i32, %arg1: i32) -> (i32, i32) {
    %c0_i32 = arith.constant 0 : i32
    %c0_i32_0 = arith.constant 0 : i32
    %c0_i32_1 = arith.constant 0 : i32
    return %c0_i32, %c0_i32_0 : i32, i32
  }
  func.func @transform_2(%arg0: i32, %arg1: i32) -> (i32, i32) {
    %c0_i32 = arith.constant 0 : i32
    %c0_i32_0 = arith.constant 0 : i32
    %c0_i32_1 = arith.constant 0 : i32
    return %c0_i32, %c0_i32_0 : i32, i32
  }
  func.func @transform_3(%arg0: i32, %arg1: i32) -> (i32, i32) {
    %c0_i32 = arith.constant 0 : i32
    %c0_i32_0 = arith.constant 0 : i32
    %c0_i32_1 = arith.constant 0 : i32
    return %c0_i32, %c0_i32_0 : i32, i32
  }
  func.func @transform_4(%arg0: i32, %arg1: i32) -> (i32, i32) {
    %c0_i32 = arith.constant 0 : i32
    %c0_i32_0 = arith.constant 0 : i32
    %c0_i32_1 = arith.constant 0 : i32
    return %c0_i32, %c0_i32_0 : i32, i32
  }
  func.func @transform_5(%arg0: i32, %arg1: i32) -> (i32, i32, i32) {
    %c0_i32 = arith.constant 0 : i32
    %c0_i32_0 = arith.constant 0 : i32
    return %arg0, %c0_i32, %arg1 : i32, i32, i32
  }
  func.func @transform_6(%arg0: i32, %arg1: i32) -> (i32, i32, i32) {
    %c0_i32 = arith.constant 0 : i32
    %c0_i32_0 = arith.constant 0 : i32
    return %arg0, %c0_i32, %arg1 : i32, i32, i32
  }
}

</mosaic_0001>

<bundles_post_ra>
// kernel: bayesian_conv2d_forward.3
= control target key start
LH: loop header
LB: loop body
LE: loop exit
PB: predicated region body
PF: predicated region fallthrough
CT: control target
= control target key end

     0   :  { %s749_s21 = smov 0   ;;  %s751_s22 = smov 0   ;;  %s820_s0 = inlined_call_operand.vmem [shape: bf16[2,36,256], index: 0, kind: input, shape index: {}]   ;;  %s821_s1 = inlined_call_operand.vmem [shape: bf16[8,36], index: 1, kind: input, shape index: {}]   ;;  %s822_s2 = inlined_call_operand.vmem [shape: f32[8,36], index: 2, kind: input, shape index: {}]   ;;  %s823_s3 = inlined_call_operand.vmem [shape: f32[8,1], index: 3, kind: input, shape index: {}]   ;;  %s824_s4 = inlined_call_operand.vmem [shape: f32[8,1], index: 4, kind: input, shape index: {}]   ;;  %s825_s5 = inlined_call_operand.vmem [shape: f32[2,8,256], index: 5, kind: input, shape index: {}]   ;;  %s826_s6 = inlined_call_operand.vmem [shape: f32[2,8,256], index: 6, kind: output, shape index: {}]  }
   0x1   :  { %s753_s23 = smov 0  }
   0x2 LB: > { %s28_s24 = sadd.s32 1, %s707_s22  ;;  %p622_p0 = scmp.ge.s32.totalorder %s711_s23, 1  ;;  %s711_s23 = sphi %s753_s23, %s16_s23   ;;  %s707_s22 = sphi %s751_s22, %s828_s22   ;;  %s703_s21 = sphi %s749_s21, %s827_s21  }
   0x3   : > { %p30_p1 = scmp.ge.s32.totalorder %s28_s24, 2  ;;  %p250_p2 = scmp.lt.s32.totalorder %s711_s23, 3 }
   0x5   : > { %s830_s24 = smov (%p30_p1, %s28_s24), 0  ;;  %p251_p3 = pnand %p622_p0, %p250_p2 }
   0x6   : > { %p298_p4 = scmp.lt.s32.totalorder (!%p251_p3), %s703_s21, 1 }
   0x7   : > { %254 = sbr.rel (%p251_p3) target bundleno = 193 (0xc1), region = 44 }
   0xc   : > { %v713_v0 = vmov 0   ;;  %v336_v1 = vld [vmem:[%s824_s4] sm:$0xff]  ;;  %s832_s21 = smov (!%p298_p4, %s703_s21), 1  ;;  %vm434_vm0 = vcmask 1043456   ;;  %vm373_vm1 = vcmask 1041408   ;;  %vm369_vm2 = vcmask 293888  }
   0xd   : > { %684 = vset.pattern.permute.xlu0 %v713_v0  ;;  %s658_s27 = smul.u32 40, %s832_s21  ;;  %v335_v2 = vld [vmem:[%s823_s3] sm:$0xff]  ;;  %s652_s13 = sshll.u32 %s832_s21, 4 }
   0xe   : > { %428 = vperm.xlu0 %684, %v336_v1   ;;  %v334_v44 = vld [vmem:[%s822_s2] sm:$0xff]  ;;  %s315_s16 = scalar_lea.vmem %s825_s5, %s652_s13  ;;  %s325_s19 = scalar_lea.vmem %s826_s6, %s652_s13 }
   0xf   : > { %s776_s30 = scalar_lea.vmem %s820_s0, %s658_s27  ;;  %v333_v47 = vld [vmem:[%s821_s1] sm:$0xf] }
  0x10   : > { %v332_v3 = vld [vmem:[%s776_s30 + $0x20] sm:$0x33]  ;;  %v331_v4 = vld [vmem:[%s776_s30 + $0x18] sm:$0xff]  ;;  %v330_v5 = vld [vmem:[%s776_s30 + $0x10] sm:$0xff] }
  0x11   : > { %v414_v6 = vunpack.c.l.bf16 %v332_v3  ;;  %v415_v7 = vunpack.c.h.bf16 %v332_v3  ;;  %v412_v8 = vunpack.c.l.bf16 %v331_v4  ;;  %v413_v9 = vunpack.c.h.bf16 %v331_v4  ;;  %v329_v14 = vld [vmem:[%s776_s30 + $0x8] sm:$0xff]  ;;  %v328_v19 = vld [vmem:[%s776_s30] sm:$0xff]  ;;  %v638_v22 = vld [vmem:[%s776_s30 + $0x10] sm:$0xf] }
  0x12   : > { %v357_v10 = vunpack.c.l.b16 %v332_v3  ;;  %v358_v11 = vunpack.c.h.b16 %v332_v3  ;;  %v410_v12 = vunpack.c.l.bf16 %v330_v5  ;;  %v411_v13 = vunpack.c.h.bf16 %v330_v5  ;;  %v657_v27 = vld [vmem:[%s776_s30 + $0x14] sm:$0xf0]  ;;  %v656_v28 = vld [vmem:[%s776_s30 + $0x14] sm:$0xf]  ;;  %v640_v29 = vld [vmem:[%s776_s30 + $0x18] sm:$0xf0] }
  0x13   : > { %v424_v15 = vmul.f32 %v414_v6, %v414_v6  ;;  %v425_v16 = vmul.f32 %v415_v7, %v415_v7  ;;  %v422_v17 = vmul.f32 %v412_v8, %v412_v8  ;;  %v423_v18 = vmul.f32 %v413_v9, %v413_v9  ;;  %v630_v38 = vld [vmem:[%s776_s30] sm:$0xf]  ;;  %v655_v41 = vld [vmem:[%s776_s30 + $0x4] sm:$0xf0]  ;;  %v654_v42 = vld [vmem:[%s776_s30 + $0x4] sm:$0xf] }
  0x14   : > { %v363_v20 = vpack.c.b16 %v357_v10, %v357_v10  ;;  %v364_v21 = vpack.c.b16 %v358_v11, %v358_v11  ;;  %v420_v23 = vmul.f32 %v410_v12, %v410_v12  ;;  %v421_v24 = vmul.f32 %v411_v13, %v411_v13  ;;  %v632_v43 = vld [vmem:[%s776_s30 + $0x8] sm:$0xf0]  ;;  %v337_v9 = vld [vmem:[%s315_s16] sm:$0xff] }
  0x15   : > { %646 = vmatpush.msk.msra.mxu2 %vm434_vm0, %v424_v15  ;;  %648 = vmatpush.msk.msra.mxu3 %vm434_vm0, %v425_v16  ;;  %v408_v25 = vunpack.c.l.bf16 %v329_v14  ;;  %v409_v26 = vunpack.c.h.bf16 %v329_v14  ;;  %v406_v32 = vunpack.c.l.bf16 %v328_v19  ;;  %v407_v33 = vunpack.c.h.bf16 %v328_v19  ;;  %v338_v13 = vld [vmem:[%s315_s16 + $0x8] sm:$0xff] }
  0x16   : > { %341 = vperm.xlu0 %684, %v335_v2   ;;  %v375_v30 = vsel %vm373_vm1, %v363_v20, 0  ;;  %v378_v31 = vsel %vm373_vm1, %v364_v21, 0  ;;  %v639_v36 = vor.u32 %v657_v27, %v638_v22  ;;  %v643_v37 = vor.u32 %v656_v28, %v640_v29 }
  0x17   : > { %453 = vmatpush.msra.mxu2 %v422_v17  ;;  %473 = vmatpush.msra.mxu3 %v423_v18  ;;  %v418_v34 = vmul.f32 %v408_v25, %v408_v25  ;;  %v419_v35 = vmul.f32 %v409_v26, %v409_v26  ;;  %v416_v39 = vmul.f32 %v406_v32, %v406_v32 }
  0x18   : > { %385 = vmatpush.bf16.msra.mxu0 %v375_v30  ;;  %398 = vmatpush.bf16.msra.mxu1 %v378_v31  ;;  %v417_v40 = vmul.f32 %v407_v33, %v407_v33  ;;  %v631_v45 = vor.u32 %v655_v41, %v630_v38  ;;  %v635_v46 = vor.u32 %v654_v42, %v632_v43 }
  0x19   : > { %454 = vmatpush.msra.mxu2 %v420_v23  ;;  %474 = vmatpush.msra.mxu3 %v421_v24 }
  0x1b   : > { %455 = vmatpush.msra.mxu2 %v418_v34  ;;  %475 = vmatpush.msra.mxu3 %v419_v35 }
  0x1c   : > { %386 = vmatpush.bf16.msra.mxu0 %v639_v36  ;;  %399 = vmatpush.bf16.msra.mxu1 %v643_v37 }
  0x1d   : > { %456 = vmatpush.msra.mxu2 %v416_v39  ;;  %476 = vmatpush.msra.mxu3 %v417_v40 }
  0x1e   : > { %647 = vmatmul.msk.f32.vlgmr.msra.gmra.mxu2 %vm369_vm2, %v334_v44  ;;  %649 = vmatmul.msk.f32.vlgmr.msra.gmra.mxu3 %vm369_vm2, %v334_v44 }
  0x20   : > { %387 = vmatpush.bf16.msra.mxu0 %v631_v45  ;;  %400 = vmatpush.bf16.msra.mxu1 %v635_v46 }
  0x23   : > { %644 = vmatmul.msk.bf16.vlgmr.msra.gmra.mxu0 %vm369_vm2, %v333_v47  ;;  %645 = vmatmul.msk.bf16.vlgmr.msra.gmra.mxu1 %vm369_vm2, %v333_v47 }
  0x80   : > { %v429_v48 = vpop.permute.xlu0 %428 }
  0x88   : > { %v342_v8 = vpop.permute.xlu0 %341 }
  0xa0   : > { %v389_v49 = vpop.f32.mrf.mxu0  ;;  %v402_v50 = vpop.f32.mrf.mxu1 }
  0xa1   : > { %v458_v51 = vpop.f32.mrf.mxu2  ;;  %v478_v52 = vpop.f32.mrf.mxu3  ;;  %v390_v17 = vadd.f32 %v389_v49, %v342_v8  ;;  %v403_v20 = vadd.f32 %v402_v50, %v342_v8 }
  0xa2   : > { %v459_v53 = vadd.f32 %v458_v51, %v429_v48  ;;  %v479_v54 = vadd.f32 %v478_v52, %v429_v48 }
  0xa4   : > { %v481_v55 = vmax.f32 %v459_v53, 1e-12  ;;  %v482_v56 = vmax.f32 %v479_v54, 1e-12 }
  0xa6   : > { %685 = vrsqrt.f32 %v481_v55  ;;  %vm490_vm3 = vcmp.eq.f32.partialorder %v481_v55, inf  ;;  %v493_v10 = vand.u32 2147483648, %v481_v55  ;;  %vm492_vm4 = vcmp.eq.f32.partialorder %v481_v55, 0.0 }
  0xa7   : > { %687 = vrsqrt.f32 %v482_v56  ;;  %vm502_vm5 = vcmp.eq.f32.partialorder %v482_v56, inf  ;;  %v505_v14 = vand.u32 2147483648, %v482_v56  ;;  %vm504_vm6 = vcmp.eq.f32.partialorder %v482_v56, 0.0 }
  0xa8   : > { %v391_v57 = vpop.f32.mrf.mxu0  ;;  %v404_v58 = vpop.f32.mrf.mxu1 }
  0xac   : > { %v686_v59 = vpop.eup %685 }
  0xad   : > { %v688_v60 = vpop.eup %687  ;;  %v484_v61 = vmul.f32 %v686_v59, %v481_v55 }
  0xae   : > { %v496_v62 = vmul.f32 %v688_v60, %v482_v56 }
  0xaf   : > { %v485_v63 = vmul.f32 %v686_v59, %v484_v61 }
  0xb0   : > { %v497_v0 = vmul.f32 %v688_v60, %v496_v62 }
  0xb1   : > { %v486_v1 = vmul.f32 0.5, %v485_v63 }
  0xb2   : > { %v498_v2 = vmul.f32 0.5, %v497_v0 }
  0xb3   : > { %v487_v3 = vsub.f32 1.5, %v486_v1 }
  0xb4   : > { %v499_v4 = vsub.f32 1.5, %v498_v2 }
  0xb5   : > { %v488_v5 = vmul.f32 %v686_v59, %v487_v3 }
  0xb6   : > { %v500_v6 = vmul.f32 %v688_v60, %v499_v4 }
  0xb7   : > { %v489_v7 = vmul.f32 %v488_v5, %v481_v55 }
  0xb8   : > { %v501_v11 = vmul.f32 %v500_v6, %v482_v56 }
  0xb9   : > { %v491_v12 = vsel %vm490_vm3, %v481_v55, %v489_v7 }
  0xba   : > { %v494_v15 = vsel %vm492_vm4, %v493_v10, %v491_v12  ;;  %v503_v16 = vsel %vm502_vm5, %v482_v56, %v501_v11 }
  0xbb   : > { %v507_v18 = vmul.f32 %v494_v15, %v337_v9  ;;  %v506_v19 = vsel %vm504_vm6, %v505_v14, %v503_v16 }
  0xbc   : > { %v508_v21 = vmul.f32 %v506_v19, %v338_v13 }
  0xbd   : > { %v509_v22 = vadd.f32 %v507_v18, %v390_v17 }
  0xbe   : > { %v510_v23 = vadd.f32 %v508_v21, %v403_v20 }
  0xbf   : > { %511 = vst [vmem:[%s325_s19] sm:$0xff] %v509_v22 }
  0xc0   : > { %512 = vst [vmem:[%s325_s19 + $0x8] sm:$0xff] %v510_v23 }
  0xc1 PF: > { %s16_s23 = sadd.s32 1, %s711_s23   ;;  %s827_s21 = smov %s707_s22 }
  0xc2   : > { %p13_p5 = scmp.ge.s32.totalorder %s16_s23, 4   ;;  %s828_s22 = smov %s830_s24 }
  0xc4   :  { %15 = sbr.rel (!%p13_p5) target bundleno = 2 (0x2), region = 77 }

</bundles_post_ra>
